<compile_context>
chip_gen: v7x
topology: tpu7x:2x2x1
jax: 0.10.0
libtpu: 0.0.40
codegen_flags: <defaults>
</compile_context>

<pallas_src>
import jax
import jax.numpy as jnp
from jax import lax
from jax.experimental import pallas as pl
from jax.experimental.pallas import tpu as pltpu


MATMUL_DTYPE = jnp.bfloat16   # MXU operand dtype; jnp.float32 for exact f32 numerics


def band_conv_weights(w_hwio, W):
    """Lower a 3x3 / pad=1 / stride=1 conv along the width axis into per-dy
    block-banded matmul weights, with pure jnp ops (jit/trace friendly).

      w_hwio: (KH, KW, Cin, Cout)  ->  (KH, W*Cin, W*Cout)
      out[y, xo*Cout+co] = sum_dy taps[y+dy-1, :] @ wb[dy]

    Horizontal zero padding is implicit (out-of-range dx taps get no band
    entry); vertical padding is handled by the kernel.
    """
    KH, KW, Cin, Cout = w_hwio.shape
    xi = jnp.arange(W)[:, None]                    # input column
    xo = jnp.arange(W)[None, :]                    # output column
    dx = xi - xo + (KW // 2)                       # horizontal tap feeding (xi -> xo)
    valid = (dx >= 0) & (dx < KW)
    taps = w_hwio[:, jnp.clip(dx, 0, KW - 1), :, :]               # (KH, W, W, Cin, Cout)
    taps = jnp.where(valid[None, :, :, None, None], taps, 0.0)
    # rows = (xi, ci), cols = (xo, co)
    return jnp.transpose(taps, (0, 1, 3, 2, 4)).reshape(KH, W * Cin, W * Cout)


def batch_block_diag(wb, N):
    """(KH, K, M) per-image banded weight -> (KH, N*K, N*M) block-diagonal
    weight for the batch-in-lanes layout (lanes ordered (n, w, c))."""
    KH, K, M = wb.shape
    eye = jnp.eye(N, dtype=wb.dtype)
    return jnp.einsum('nm,dkp->dnkmp', eye, wb).reshape(KH, N * K, N * M)


def make_basic_block_kernel(H, L):
    """relu(conv2(relu(conv1(x) + b1)) + b2 + x) in the (H, L) = (H, N*W*C)
    batch-in-lanes layout.  BN scales are pre-folded into the conv weights."""

    def kernel(x_ref, w1_ref, w2_ref, b1_ref, b2_ref, o_ref):
        x = x_ref[...]                                   # (H, L) f32; also the residual
        md = w1_ref.dtype                                # MXU operand dtype (bf16/f32)

        # Row-index masks zeroing the wrapped edge rows of the vertical taps
        # (the only physical padding left; horizontal padding lives in the weights).
        row = lax.broadcasted_iota(jnp.int32, (H, L), 0)
        top_ok = row >= 1          # dy=0 tap (row y-1) is in range
        bot_ok = row <= H - 2      # dy=2 tap (row y+1) is in range

        def conv3x3(a, w_ref):
            # Vertical taps built vreg-resident: XLU roll + VPU edge select,
            # no staging stores / reloads.
            t0 = jnp.where(top_ok, pltpu.roll(a, shift=1, axis=0), 0.0)      # a[y-1]
            t2 = jnp.where(bot_ok, pltpu.roll(a, shift=H - 1, axis=0), 0.0)  # a[y+1]
            # Three banded matmuls, back-to-back f32 accumulation (MRB-friendly).
            acc = jnp.dot(t0.astype(md), w_ref[0], preferred_element_type=jnp.float32)
            acc = acc + jnp.dot(a.astype(md), w_ref[1], preferred_element_type=jnp.float32)
            acc = acc + jnp.dot(t2.astype(md), w_ref[2], preferred_element_type=jnp.float32)
            return acc

        h = jnp.maximum(conv3x3(x, w1_ref) + b1_ref[...], 0.0)   # conv1 + bn1 + relu
        y = conv3x3(h, w2_ref) + b2_ref[...] + x                 # conv2 + bn2 + residual
        o_ref[...] = jnp.maximum(y, 0.0)                         # dense 128-lane store

    return kernel


def basic_block_forward(x_nhwc, w1_hwio, w2_hwio, s1, b1, s2, b2):
    """x_nhwc: (N, H, W, C); w*_hwio: (3, 3, C, C); s*, b*: (C,) folded eval-BN."""
    N, H, W, C = x_nhwc.shape
    assert w1_hwio.shape[-1] == C and w2_hwio.shape[-1] == C, \
        "identity residual requires Cin == Cout (stride=1, no downsample)"
    L = N * W * C   # lane width; 128 at the toy shapes -> fully lane-dense

    # ---- layout plumbing (one-time, all jnp -> jittable) ----
    # batch-in-lanes activation slab: (H, N*W*C), lanes ordered (n, w, c)
    x2d = jnp.transpose(x_nhwc, (1, 0, 2, 3)).reshape(H, L)
    # BN scale folded into conv weights, banded along W, block-diag over batch, bf16
    w1_b = batch_block_diag(band_conv_weights(w1_hwio * s1, W), N).astype(MATMUL_DTYPE)
    w2_b = batch_block_diag(band_conv_weights(w2_hwio * s2, W), N).astype(MATMUL_DTYPE)
    # per-lane biases (stay f32)
    b1_r = jnp.tile(b1, N * W).reshape(1, L).astype(jnp.float32)
    b2_r = jnp.tile(b2, N * W).reshape(1, L).astype(jnp.float32)

    kernel = make_basic_block_kernel(H, L)
    out2d = pl.pallas_call(
        kernel,
        out_shape=jax.ShapeDtypeStruct((H, L), jnp.float32),
        grid_spec=pltpu.PrefetchScalarGridSpec(
            num_scalar_prefetch=0,
            grid=(1,),
            in_specs=[
                pl.BlockSpec((H, L), lambda i: (0, 0)),        # x (and residual)
                pl.BlockSpec((3, L, L), lambda i: (0, 0, 0)),  # w1 (banded, resident)
                pl.BlockSpec((3, L, L), lambda i: (0, 0, 0)),  # w2 (banded, resident)
                pl.BlockSpec((1, L), lambda i: (0, 0)),        # b1
                pl.BlockSpec((1, L), lambda i: (0, 0)),        # b2
            ],
            out_specs=pl.BlockSpec((H, L), lambda i: (0, 0)),
        ),
        compiler_params=pltpu.CompilerParams(
            dimension_semantics=("arbitrary",)),
    )(x2d, w1_b, w2_b, b1_r, b2_r)

    return jnp.transpose(out2d.reshape(H, N, W, C), (1, 0, 2, 3))


def ref_forward(x_nhwc, w1_hwio, w2_hwio, bn1, bn2, eps=1e-5,
                matmul_dtype=jnp.float32):
    """Pure-JAX reference of the BasicBlock forward (NHWC, eval-mode BN).
    `matmul_dtype` mirrors the kernel's mixed-precision recipe: conv operands
    (activations and BN-folded weights) are rounded to that dtype while the
    accumulation and everything else stays f32.  With jnp.float32 this is the
    exact eval-mode module forward."""
    g1, be1, m1, v1 = bn1
    g2, be2, m2, v2 = bn2
    s1 = g1 / jnp.sqrt(v1 + eps); b1 = be1 - m1 * s1
    s2 = g2 / jnp.sqrt(v2 + eps); b2 = be2 - m2 * s2
    q = lambda a: a.astype(matmul_dtype).astype(jnp.float32)
    conv = lambda a, w: lax.conv_general_dilated(
        a, w, (1, 1), ((1, 1), (1, 1)),
        dimension_numbers=('NHWC', 'HWIO', 'NHWC'),
        precision=lax.Precision.HIGHEST)
    h = jnp.maximum(conv(q(x_nhwc), q(w1_hwio * s1)) + b1, 0.0)
    y = conv(q(h), q(w2_hwio * s2)) + b2 + x_nhwc
    return jnp.maximum(y, 0.0)


if __name__ == "__main__":
    N, C, H, W = 2, 4, 16, 16          # in_ch = out_ch = 4, stride=1, no downsample
    eps = 1e-5

    key = jax.random.PRNGKey(0)
    kx, kw1, kw2, kg1, kb1, km1, kv1, kg2, kb2, km2, kv2 = jax.random.split(key, 11)

    # Input (PyTorch-style NCHW), then transpose to NHWC for the kernel.
    x_nchw = jax.random.normal(kx, (N, C, H, W), jnp.float32)
    x_nhwc = jnp.transpose(x_nchw, (0, 2, 3, 1))

    # Conv weights in PyTorch OIHW layout -> HWIO.
    w1_oihw = jax.random.normal(kw1, (C, C, 3, 3), jnp.float32) * 0.2
    w2_oihw = jax.random.normal(kw2, (C, C, 3, 3), jnp.float32) * 0.2
    w1_hwio = jnp.transpose(w1_oihw, (2, 3, 1, 0))          # (3, 3, Cin, Cout)
    w2_hwio = jnp.transpose(w2_oihw, (2, 3, 1, 0))

    # Deterministic eval-mode BatchNorm parameters.
    g1 = 0.5 + jax.random.uniform(kg1, (C,), jnp.float32)
    be1 = 0.1 * jax.random.normal(kb1, (C,), jnp.float32)
    m1 = 0.1 * jax.random.normal(km1, (C,), jnp.float32)
    v1 = 0.5 + jax.random.uniform(kv1, (C,), jnp.float32)
    g2 = 0.5 + jax.random.uniform(kg2, (C,), jnp.float32)
    be2 = 0.1 * jax.random.normal(kb2, (C,), jnp.float32)
    m2 = 0.1 * jax.random.normal(km2, (C,), jnp.float32)
    v2 = 0.5 + jax.random.uniform(kv2, (C,), jnp.float32)

    # Fold eval-mode BN into per-channel scale/bias: y = conv * s + b
    s1 = g1 / jnp.sqrt(v1 + eps); b1 = be1 - m1 * s1
    s2 = g2 / jnp.sqrt(v2 + eps); b2 = be2 - m2 * s2

    forward = jax.jit(basic_block_forward)
    out = jax.block_until_ready(forward(x_nhwc, w1_hwio, w2_hwio, s1, b1, s2, b2))

    # Validate against a JAX reference that follows the same mixed-precision
    # recipe (bf16 MXU operands, f32 accumulation/bias/residual).  With
    # MATMUL_DTYPE = jnp.float32 this is the exact f32 module forward.
    ref = jax.block_until_ready(
        ref_forward(x_nhwc, w1_hwio, w2_hwio,
                    (g1, be1, m1, v1), (g2, be2, m2, v2), eps,
                    matmul_dtype=MATMUL_DTYPE))

    if not jnp.allclose(out, ref, atol=1e-3, rtol=1e-3):
        raise AssertionError("Pallas BasicBlock output mismatch vs JAX reference")

    print("KERNEL_OK")
</pallas_src>

<mosaic_0001>
module attributes {stable_mosaic.version = 11 : i64} {
  func.func @kernel(%arg0: i32, %arg1: memref<16x128xf32, #tpu.memory_space<vmem>>, %arg2: memref<3x128x128xbf16, #tpu.memory_space<vmem>>, %arg3: memref<3x128x128xbf16, #tpu.memory_space<vmem>>, %arg4: memref<1x128xf32, #tpu.memory_space<vmem>>, %arg5: memref<1x128xf32, #tpu.memory_space<vmem>>, %arg6: memref<16x128xf32, #tpu.memory_space<vmem>>) attributes {dimension_semantics = [#tpu.dimension_semantics<arbitrary>], iteration_bounds = array<i64: 1>, scalar_prefetch = 0 : i64, scratch_operands = 0 : i64, tpu.core_type = #tpu.core_type<tc>, window_params = [{pipeline_mode = #tpu.pipeline_mode<synchronous>, transform_indices = @transform_0, window_bounds = array<i64: 16, 128>}, {pipeline_mode = #tpu.pipeline_mode<synchronous>, transform_indices = @transform_1, window_bounds = array<i64: 3, 128, 128>}, {pipeline_mode = #tpu.pipeline_mode<synchronous>, transform_indices = @transform_2, window_bounds = array<i64: 3, 128, 128>}, {pipeline_mode = #tpu.pipeline_mode<synchronous>, transform_indices = @transform_3, window_bounds = array<i64: 1, 128>}, {pipeline_mode = #tpu.pipeline_mode<synchronous>, transform_indices = @transform_4, window_bounds = array<i64: 1, 128>}, {pipeline_mode = #tpu.pipeline_mode<synchronous>, transform_indices = @transform_5, window_bounds = array<i64: 16, 128>}]} {
    %c0 = arith.constant 0 : index
    %c0_0 = arith.constant 0 : index
    %0 = vector.load %arg1[%c0, %c0_0] : memref<16x128xf32, #tpu.memory_space<vmem>>, vector<16x128xf32>
    %1 = tpu.iota {dimensions = array<i32: 0>} : vector<16x128xi32>
    %c1_i32 = arith.constant 1 : i32
    %2 = vector.broadcast %c1_i32 : i32 to vector<16x128xi32>
    %3 = arith.cmpi sge, %1, %2 : vector<16x128xi32>
    %c14_i32 = arith.constant 14 : i32
    %4 = vector.broadcast %c14_i32 : i32 to vector<16x128xi32>
    %5 = arith.cmpi sle, %1, %4 : vector<16x128xi32>
    %c1_i32_1 = arith.constant 1 : i32
    %6 = tpu.dynamic_rotate %0 by %c1_i32_1 dim 0 : vector<16x128xf32>, i32 -> vector<16x128xf32>
    %cst = arith.constant 0.000000e+00 : f32
    %7 = vector.broadcast %cst : f32 to vector<16x128xf32>
    %8 = arith.select %3, %6, %7 : vector<16x128xi1>, vector<16x128xf32>
    %c15_i32 = arith.constant 15 : i32
    %9 = tpu.dynamic_rotate %0 by %c15_i32 dim 0 : vector<16x128xf32>, i32 -> vector<16x128xf32>
    %cst_2 = arith.constant 0.000000e+00 : f32
    %10 = vector.broadcast %cst_2 : f32 to vector<16x128xf32>
    %11 = arith.select %5, %9, %10 : vector<16x128xi1>, vector<16x128xf32>
    %12 = arith.truncf %8 : vector<16x128xf32> to vector<16x128xbf16>
    %c0_3 = arith.constant 0 : index
    %c0_4 = arith.constant 0 : index
    %c0_5 = arith.constant 0 : index
    %13 = vector.load %arg2[%c0_3, %c0_4, %c0_5] : memref<3x128x128xbf16, #tpu.memory_space<vmem>>, vector<1x128x128xbf16>
    %14 = vector.shape_cast %13 : vector<1x128x128xbf16> to vector<128x128xbf16>
    %cst_6 = arith.constant dense<0.000000e+00> : vector<16x128xf32>
    %15 = tpu.matmul %12, %14, %cst_6 {dimension_numbers = #tpu.dot_dimension_numbers<[1], [0], [0], [1], [0, 0, 1, 1], [], []>} : vector<16x128xbf16>, vector<128x128xbf16>, vector<16x128xf32> -> vector<16x128xf32>
    %16 = arith.truncf %0 : vector<16x128xf32> to vector<16x128xbf16>
    %c1 = arith.constant 1 : index
    %c0_7 = arith.constant 0 : index
    %c0_8 = arith.constant 0 : index
    %17 = vector.load %arg2[%c1, %c0_7, %c0_8] : memref<3x128x128xbf16, #tpu.memory_space<vmem>>, vector<1x128x128xbf16>
    %18 = vector.shape_cast %17 : vector<1x128x128xbf16> to vector<128x128xbf16>
    %cst_9 = arith.constant dense<0.000000e+00> : vector<16x128xf32>
    %19 = tpu.matmul %16, %18, %cst_9 {dimension_numbers = #tpu.dot_dimension_numbers<[1], [0], [0], [1], [0, 0, 1, 1], [], []>} : vector<16x128xbf16>, vector<128x128xbf16>, vector<16x128xf32> -> vector<16x128xf32>
    %20 = arith.addf %15, %19 : vector<16x128xf32>
    %21 = arith.truncf %11 : vector<16x128xf32> to vector<16x128xbf16>
    %c2 = arith.constant 2 : index
    %c0_10 = arith.constant 0 : index
    %c0_11 = arith.constant 0 : index
    %22 = vector.load %arg2[%c2, %c0_10, %c0_11] : memref<3x128x128xbf16, #tpu.memory_space<vmem>>, vector<1x128x128xbf16>
    %23 = vector.shape_cast %22 : vector<1x128x128xbf16> to vector<128x128xbf16>
    %cst_12 = arith.constant dense<0.000000e+00> : vector<16x128xf32>
    %24 = tpu.matmul %21, %23, %cst_12 {dimension_numbers = #tpu.dot_dimension_numbers<[1], [0], [0], [1], [0, 0, 1, 1], [], []>} : vector<16x128xbf16>, vector<128x128xbf16>, vector<16x128xf32> -> vector<16x128xf32>
    %25 = arith.addf %20, %24 : vector<16x128xf32>
    %c0_13 = arith.constant 0 : index
    %c0_14 = arith.constant 0 : index
    %26 = vector.load %arg4[%c0_13, %c0_14] : memref<1x128xf32, #tpu.memory_space<vmem>>, vector<1x128xf32>
    %27 = vector.broadcast %26 : vector<1x128xf32> to vector<16x128xf32>
    %28 = arith.addf %25, %27 : vector<16x128xf32>
    %cst_15 = arith.constant 0.000000e+00 : f32
    %29 = vector.broadcast %cst_15 : f32 to vector<16x128xf32>
    %30 = arith.maximumf %28, %29 : vector<16x128xf32>
    %c1_i32_16 = arith.constant 1 : i32
    %31 = tpu.dynamic_rotate %30 by %c1_i32_16 dim 0 : vector<16x128xf32>, i32 -> vector<16x128xf32>
    %cst_17 = arith.constant 0.000000e+00 : f32
    %32 = vector.broadcast %cst_17 : f32 to vector<16x128xf32>
    %33 = arith.select %3, %31, %32 : vector<16x128xi1>, vector<16x128xf32>
    %c15_i32_18 = arith.constant 15 : i32
    %34 = tpu.dynamic_rotate %30 by %c15_i32_18 dim 0 : vector<16x128xf32>, i32 -> vector<16x128xf32>
    %cst_19 = arith.constant 0.000000e+00 : f32
    %35 = vector.broadcast %cst_19 : f32 to vector<16x128xf32>
    %36 = arith.select %5, %34, %35 : vector<16x128xi1>, vector<16x128xf32>
    %37 = arith.truncf %33 : vector<16x128xf32> to vector<16x128xbf16>
    %c0_20 = arith.constant 0 : index
    %c0_21 = arith.constant 0 : index
    %c0_22 = arith.constant 0 : index
    %38 = vector.load %arg3[%c0_20, %c0_21, %c0_22] : memref<3x128x128xbf16, #tpu.memory_space<vmem>>, vector<1x128x128xbf16>
    %39 = vector.shape_cast %38 : vector<1x128x128xbf16> to vector<128x128xbf16>
    %cst_23 = arith.constant dense<0.000000e+00> : vector<16x128xf32>
    %40 = tpu.matmul %37, %39, %cst_23 {dimension_numbers = #tpu.dot_dimension_numbers<[1], [0], [0], [1], [0, 0, 1, 1], [], []>} : vector<16x128xbf16>, vector<128x128xbf16>, vector<16x128xf32> -> vector<16x128xf32>
    %41 = arith.truncf %30 : vector<16x128xf32> to vector<16x128xbf16>
    %c1_24 = arith.constant 1 : index
    %c0_25 = arith.constant 0 : index
    %c0_26 = arith.constant 0 : index
    %42 = vector.load %arg3[%c1_24, %c0_25, %c0_26] : memref<3x128x128xbf16, #tpu.memory_space<vmem>>, vector<1x128x128xbf16>
    %43 = vector.shape_cast %42 : vector<1x128x128xbf16> to vector<128x128xbf16>
    %cst_27 = arith.constant dense<0.000000e+00> : vector<16x128xf32>
    %44 = tpu.matmul %41, %43, %cst_27 {dimension_numbers = #tpu.dot_dimension_numbers<[1], [0], [0], [1], [0, 0, 1, 1], [], []>} : vector<16x128xbf16>, vector<128x128xbf16>, vector<16x128xf32> -> vector<16x128xf32>
    %45 = arith.addf %40, %44 : vector<16x128xf32>
    %46 = arith.truncf %36 : vector<16x128xf32> to vector<16x128xbf16>
    %c2_28 = arith.constant 2 : index
    %c0_29 = arith.constant 0 : index
    %c0_30 = arith.constant 0 : index
    %47 = vector.load %arg3[%c2_28, %c0_29, %c0_30] : memref<3x128x128xbf16, #tpu.memory_space<vmem>>, vector<1x128x128xbf16>
    %48 = vector.shape_cast %47 : vector<1x128x128xbf16> to vector<128x128xbf16>
    %cst_31 = arith.constant dense<0.000000e+00> : vector<16x128xf32>
    %49 = tpu.matmul %46, %48, %cst_31 {dimension_numbers = #tpu.dot_dimension_numbers<[1], [0], [0], [1], [0, 0, 1, 1], [], []>} : vector<16x128xbf16>, vector<128x128xbf16>, vector<16x128xf32> -> vector<16x128xf32>
    %50 = arith.addf %45, %49 : vector<16x128xf32>
    %c0_32 = arith.constant 0 : index
    %c0_33 = arith.constant 0 : index
    %51 = vector.load %arg5[%c0_32, %c0_33] : memref<1x128xf32, #tpu.memory_space<vmem>>, vector<1x128xf32>
    %52 = vector.broadcast %51 : vector<1x128xf32> to vector<16x128xf32>
    %53 = arith.addf %50, %52 : vector<16x128xf32>
    %54 = arith.addf %53, %0 : vector<16x128xf32>
    %cst_34 = arith.constant 0.000000e+00 : f32
    %55 = vector.broadcast %cst_34 : f32 to vector<16x128xf32>
    %56 = arith.maximumf %54, %55 : vector<16x128xf32>
    %c0_35 = arith.constant 0 : index
    %c0_36 = arith.constant 0 : index
    %57 = vector.load %arg6[%c0_35, %c0_36] : memref<16x128xf32, #tpu.memory_space<vmem>>, vector<16x128xf32>
    tpu.vector_store %arg6[%c0_35, %c0_36], %56 {strides = array<i32>} : memref<16x128xf32, #tpu.memory_space<vmem>>, vector<16x128xf32>,
    return
  }
  func.func @transform_0(%arg0: i32) -> (i32, i32) {
    %c0_i32 = arith.constant 0 : i32
    %c0_i32_0 = arith.constant 0 : i32
    %c0_i32_1 = arith.constant 0 : i32
    return %c0_i32, %c0_i32_0 : i32, i32
  }
  func.func @transform_1(%arg0: i32) -> (i32, i32, i32) {
    %c0_i32 = arith.constant 0 : i32
    %c0_i32_0 = arith.constant 0 : i32
    %c0_i32_1 = arith.constant 0 : i32
    %c0_i32_2 = arith.constant 0 : i32
    return %c0_i32, %c0_i32_0, %c0_i32_1 : i32, i32, i32
  }
  func.func @transform_2(%arg0: i32) -> (i32, i32, i32) {
    %c0_i32 = arith.constant 0 : i32
    %c0_i32_0 = arith.constant 0 : i32
    %c0_i32_1 = arith.constant 0 : i32
    %c0_i32_2 = arith.constant 0 : i32
    return %c0_i32, %c0_i32_0, %c0_i32_1 : i32, i32, i32
  }
  func.func @transform_3(%arg0: i32) -> (i32, i32) {
    %c0_i32 = arith.constant 0 : i32
    %c0_i32_0 = arith.constant 0 : i32
    %c0_i32_1 = arith.constant 0 : i32
    return %c0_i32, %c0_i32_0 : i32, i32
  }
  func.func @transform_4(%arg0: i32) -> (i32, i32) {
    %c0_i32 = arith.constant 0 : i32
    %c0_i32_0 = arith.constant 0 : i32
    %c0_i32_1 = arith.constant 0 : i32
    return %c0_i32, %c0_i32_0 : i32, i32
  }
  func.func @transform_5(%arg0: i32) -> (i32, i32) {
    %c0_i32 = arith.constant 0 : i32
    %c0_i32_0 = arith.constant 0 : i32
    %c0_i32_1 = arith.constant 0 : i32
    return %c0_i32, %c0_i32_0 : i32, i32
  }
}

</mosaic_0001>

<bundles_post_ra>
// kernel: tile.13
= control target key start
LH: loop header
LB: loop body
LE: loop exit
PB: predicated region body
PF: predicated region fallthrough
CT: control target
= control target key end

     0   :  { %s40_s0 = inlined_call_operand.vmem [shape: f32[4], index: 0, kind: input, shape index: {}]   ;;  %s41_s1 = inlined_call_operand.vmem [shape: f32[32,4], index: 1, kind: output, shape index: {}]  }
   0x1   :  { %v4_v0 = vld [vmem:[%s40_s0] ss:$0 sm:$0xff] }
   0x2   :  { %5 = vst [vmem:[%s41_s1] sm:$0xff] %v4_v0  ;;  %12 = vst [vmem:[%s41_s1 + $0x8] sm:$0xff] %v4_v0 }
   0x3   :  { %13 = vst [vmem:[%s41_s1 + $0x10] sm:$0xff] %v4_v0  ;;  %14 = vst [vmem:[%s41_s1 + $0x18] sm:$0xff] %v4_v0 }

// kernel: tile.14
= control target key start
LH: loop header
LB: loop body
LE: loop exit
PB: predicated region body
PF: predicated region fallthrough
CT: control target
= control target key end

     0   :  { %s259_s10 = smov 124   ;;  %s260_s11 = smov 116   ;;  %vm3_vm0 = vcmask 31744   ;;  %vm9_vm1 = vcmask 1048544   ;;  %vm15_vm2 = vcmask 1015744   ;;  %vm21_vm3 = vcmask 982944   ;;  %s399_s0 = inlined_call_operand.vmem [shape: f32[32,4], index: 0, kind: input, shape index: {}]   ;;  %s400_s1 = inlined_call_operand.vmem [shape: f32[1,128], index: 1, kind: output, shape index: {}]  }
   0x1   :  { %v197_v0 = vld [vmem:[%s399_s0 + $0x1f] sm:$0x1]   ;;  %v199_v1 = vld [vmem:[%s399_s0 + $0x1d] sm:$0x1]   ;;  %v198_v2 = vld [vmem:[%s399_s0 + $0x1e] sm:$0x1]  }
   0x2   :  { %7 = vrot.lane.b32.xlu0 %v197_v0, %s259_s10  ;;  %19 = vrot.lane.b32.xlu1 %v199_v1, %s260_s11  ;;  %v200_v3 = vld [vmem:[%s399_s0 + $0x1c] sm:$0x1]   ;;  %s261_s16 = smov 120   ;;  %s262_s17 = smov 112   ;;  %v201_v4 = vld [vmem:[%s399_s0 + $0x1b] sm:$0x1]  }
   0x3   :  { %v202_v5 = vld [vmem:[%s399_s0 + $0x1a] sm:$0x1]   ;;  %s263_s22 = smov 108   ;;  %s264_s23 = smov 104   ;;  %v203_v6 = vld [vmem:[%s399_s0 + $0x19] sm:$0x1]  }
   0x4   :  { %v204_v7 = vld [vmem:[%s399_s0 + $0x18] sm:$0x1]   ;;  %s265_s28 = smov 100   ;;  %s266_s29 = smov 96   ;;  %v205_v8 = vld [vmem:[%s399_s0 + $0x17] sm:$0x1]  }
   0x5   :  { %v206_v9 = vld [vmem:[%s399_s0 + $0x16] sm:$0x1]   ;;  %v2_v10 = vld [vmem:[%s399_s0] sm:$0x1]   ;;  %s267_s7 = smov 92   ;;  %s268_s8 = smov 88  }
   0x6   :  { %13 = vrot.lane.b32.xlu0 %v198_v2, %s261_s16  ;;  %25 = vrot.lane.b32.xlu1 %v200_v3, %s262_s17  ;;  %4 = vst.msk [vmem:[#allocation0] sm:$0x1] %vm3_vm0, %v2_v10   ;;  %v207_v11 = vld [vmem:[%s399_s0 + $0x15] sm:$0x1]   ;;  %v208_v12 = vld [vmem:[%s399_s0 + $0x14] sm:$0x1]  }
   0x7   :  { %s269_s13 = smov 84   ;;  %s270_s14 = smov 80   ;;  %v209_v13 = vld [vmem:[%s399_s0 + $0x13] sm:$0x1]   ;;  %v210_v14 = vld [vmem:[%s399_s0 + $0x12] sm:$0x1]  }
   0x8   :  { %s271_s19 = smov 76   ;;  %s272_s20 = smov 72   ;;  %v211_v15 = vld [vmem:[%s399_s0 + $0x11] sm:$0x1]   ;;  %v212_v16 = vld [vmem:[%s399_s0 + $0x10] sm:$0x1]  }
   0x9   :  { %s273_s25 = smov 68   ;;  %s274_s26 = smov 64   ;;  %v213_v17 = vld [vmem:[%s399_s0 + $0xf] sm:$0x1]   ;;  %v214_v18 = vld [vmem:[%s399_s0 + $0xe] sm:$0x1]  }
   0xa   :  { %31 = vrot.lane.b32.xlu0 %v201_v4, %s263_s22  ;;  %37 = vrot.lane.b32.xlu1 %v202_v5, %s264_s23  ;;  %s275_s2 = smov 60   ;;  %s276_s3 = smov 56   ;;  %v215_v19 = vld [vmem:[%s399_s0 + $0xd] sm:$0x1]   ;;  %v216_v20 = vld [vmem:[%s399_s0 + $0xc] sm:$0x1]  }
   0xb   :  { %s278_s9 = smov 48   ;;  %v217_v21 = vld [vmem:[%s399_s0 + $0xb] sm:$0x1]   ;;  %v218_v22 = vld [vmem:[%s399_s0 + $0xa] sm:$0x1]   ;;  %s280_s15 = smov 40  }
   0xc   :  { %v219_v23 = vld [vmem:[%s399_s0 + $0x9] sm:$0x1]   ;;  %v220_v24 = vld [vmem:[%s399_s0 + $0x8] sm:$0x1]   ;;  %s282_s21 = smov 32   ;;  %s284_s27 = smov 24  }
   0xd   :  { %v221_v25 = vld [vmem:[%s399_s0 + $0x7] sm:$0x1]   ;;  %v222_v26 = vld [vmem:[%s399_s0 + $0x6] sm:$0x1]   ;;  %v223_v27 = vld [vmem:[%s399_s0 + $0x5] sm:$0x1]  }
   0xe   :  { %43 = vrot.lane.b32.xlu0 %v203_v6, %s265_s28  ;;  %49 = vrot.lane.b32.xlu1 %v204_v7, %s266_s29  ;;  %v224_v28 = vld [vmem:[%s399_s0 + $0x4] sm:$0x1]   ;;  %s286_s4 = smov 16   ;;  %v225_v29 = vld [vmem:[%s399_s0 + $0x3] sm:$0x1]   ;;  %s288_s10 = smov 8  }
   0xf   :  { %v226_v30 = vld [vmem:[%s399_s0 + $0x2] sm:$0x1]   ;;  %v227_v31 = vld [vmem:[%s399_s0 + $0x1] sm:$0x1]   ;;  %s289_s0 = smov 4   ;;  %vm27_vm4 = vcmask 950144  }
  0x10   :  { %vm33_vm5 = vcmask 917344   ;;  %vm39_vm6 = vcmask 884544   ;;  %vm45_vm7 = vcmask 851744   ;;  %vm51_vm8 = vcmask 818944  }
  0x11   :  { %vm57_vm9 = vcmask 786144   ;;  %vm63_vm10 = vcmask 753344   ;;  %vm69_vm11 = vcmask 720544   ;;  %vm75_vm12 = vcmask 687744  }
  0x12   :  { %55 = vrot.lane.b32.xlu0 %v205_v8, %s267_s7  ;;  %61 = vrot.lane.b32.xlu1 %v206_v9, %s268_s8  ;;  %s277_s8 = smov 52   ;;  %vm81_vm13 = vcmask 654944   ;;  %vm87_vm14 = vcmask 622144   ;;  %vm93_vm15 = vcmask 589344   ;;  %vm99_vm0 = vcmask 556544  }
  0x16   :  { %67 = vrot.lane.b32.xlu0 %v207_v11, %s269_s13  ;;  %73 = vrot.lane.b32.xlu1 %v208_v12, %s270_s14  ;;  %s279_s14 = smov 44  }
  0x1a   :  { %79 = vrot.lane.b32.xlu0 %v209_v13, %s271_s19  ;;  %85 = vrot.lane.b32.xlu1 %v210_v14, %s272_s20  ;;  %s281_s20 = smov 36  }
  0x1e   :  { %91 = vrot.lane.b32.xlu0 %v211_v15, %s273_s25  ;;  %97 = vrot.lane.b32.xlu1 %v212_v16, %s274_s26  ;;  %s283_s26 = smov 28  }
  0x22   :  { %103 = vrot.lane.b32.xlu0 %v213_v17, %s275_s2  ;;  %109 = vrot.lane.b32.xlu1 %v214_v18, %s276_s3  ;;  %s285_s3 = smov 20  }
  0x26   :  { %115 = vrot.lane.b32.xlu0 %v215_v19, %s277_s8  ;;  %121 = vrot.lane.b32.xlu1 %v216_v20, %s278_s9  ;;  %s287_s9 = smov 12  }
  0x2a   :  { %127 = vrot.lane.b32.xlu0 %v217_v21, %s279_s14  ;;  %133 = vrot.lane.b32.xlu1 %v218_v22, %s280_s15 }
  0x2e   :  { %139 = vrot.lane.b32.xlu0 %v219_v23, %s281_s20  ;;  %145 = vrot.lane.b32.xlu1 %v220_v24, %s282_s21 }
  0x32   :  { %151 = vrot.lane.b32.xlu0 %v221_v25, %s283_s26  ;;  %157 = vrot.lane.b32.xlu1 %v222_v26, %s284_s27 }
  0x36   :  { %163 = vrot.lane.b32.xlu0 %v223_v27, %s285_s3  ;;  %169 = vrot.lane.b32.xlu1 %v224_v28, %s286_s4 }
  0x3a   :  { %175 = vrot.lane.b32.xlu0 %v225_v29, %s287_s9  ;;  %181 = vrot.lane.b32.xlu1 %v226_v30, %s288_s10 }
  0x3e   :  { %187 = vrot.lane.b32.xlu0 %v227_v31, %s289_s0 }
  0x74   :  { %v8_v32 = vpop.permute.xlu0 %7   ;;  %v20_v33 = vpop.permute.xlu1 %19  }
  0x75   :  { %10 = vst.msk [vmem:[#allocation0] sm:$0x1] %vm9_vm1, %v8_v32   ;;  %vm105_vm1 = vcmask 523744  }
  0x78   :  { %v14_v34 = vpop.permute.xlu0 %13   ;;  %v26_v35 = vpop.permute.xlu1 %25  }
  0x79   :  { %16 = vst.msk [vmem:[#allocation0] sm:$0x1] %vm15_vm2, %v14_v34   ;;  %vm111_vm2 = vcmask 490944  }
  0x7a   :  { %22 = vst.msk [vmem:[#allocation0] sm:$0x1] %vm21_vm3, %v20_v33   ;;  %vm117_vm3 = vcmask 458144  }
  0x7b   :  { %28 = vst.msk [vmem:[#allocation0] sm:$0x1] %vm27_vm4, %v26_v35   ;;  %vm123_vm4 = vcmask 425344  }
  0x7c   :  { %v32_v36 = vpop.permute.xlu0 %31   ;;  %v38_v37 = vpop.permute.xlu1 %37  }
  0x7d   :  { %34 = vst.msk [vmem:[#allocation0] sm:$0x1] %vm33_vm5, %v32_v36   ;;  %vm129_vm5 = vcmask 392544  }
  0x7e   :  { %40 = vst.msk [vmem:[#allocation0] sm:$0x1] %vm39_vm6, %v38_v37   ;;  %vm135_vm6 = vcmask 359744  }
  0x80   :  { %v44_v38 = vpop.permute.xlu0 %43   ;;  %v50_v39 = vpop.permute.xlu1 %49  }
  0x81   :  { %46 = vst.msk [vmem:[#allocation0] sm:$0x1] %vm45_vm7, %v44_v38   ;;  %vm141_vm7 = vcmask 326944  }
  0x82   :  { %52 = vst.msk [vmem:[#allocation0] sm:$0x1] %vm51_vm8, %v50_v39   ;;  %vm147_vm8 = vcmask 294144  }
  0x84   :  { %v56_v40 = vpop.permute.xlu0 %55   ;;  %v62_v41 = vpop.permute.xlu1 %61  }
  0x85   :  { %58 = vst.msk [vmem:[#allocation0] sm:$0x1] %vm57_vm9, %v56_v40   ;;  %vm153_vm9 = vcmask 261344  }
  0x86   :  { %64 = vst.msk [vmem:[#allocation0] sm:$0x1] %vm63_vm10, %v62_v41   ;;  %vm159_vm10 = vcmask 228544  }
  0x88   :  { %v68_v42 = vpop.permute.xlu0 %67   ;;  %v74_v43 = vpop.permute.xlu1 %73  }
  0x89   :  { %70 = vst.msk [vmem:[#allocation0] sm:$0x1] %vm69_vm11, %v68_v42   ;;  %vm165_vm11 = vcmask 195744  }
  0x8a   :  { %76 = vst.msk [vmem:[#allocation0] sm:$0x1] %vm75_vm12, %v74_v43   ;;  %vm171_vm12 = vcmask 162944  }
  0x8c   :  { %v80_v44 = vpop.permute.xlu0 %79   ;;  %v86_v45 = vpop.permute.xlu1 %85  }
  0x8d   :  { %82 = vst.msk [vmem:[#allocation0] sm:$0x1] %vm81_vm13, %v80_v44   ;;  %vm177_vm13 = vcmask 130144  }
  0x8e   :  { %88 = vst.msk [vmem:[#allocation0] sm:$0x1] %vm87_vm14, %v86_v45   ;;  %vm183_vm14 = vcmask 97344  }
  0x90   :  { %v92_v46 = vpop.permute.xlu0 %91   ;;  %v98_v47 = vpop.permute.xlu1 %97  }
  0x91   :  { %94 = vst.msk [vmem:[#allocation0] sm:$0x1] %vm93_vm15, %v92_v46   ;;  %vm189_vm15 = vcmask 64544  }
  0x92   :  { %100 = vst.msk [vmem:[#allocation0] sm:$0x1] %vm99_vm0, %v98_v47  }
  0x94   :  { %v104_v48 = vpop.permute.xlu0 %103   ;;  %v110_v49 = vpop.permute.xlu1 %109  }
  0x95   :  { %106 = vst.msk [vmem:[#allocation0] sm:$0x1] %vm105_vm1, %v104_v48  }
  0x96   :  { %112 = vst.msk [vmem:[#allocation0] sm:$0x1] %vm111_vm2, %v110_v49  }
  0x98   :  { %v116_v50 = vpop.permute.xlu0 %115   ;;  %v122_v51 = vpop.permute.xlu1 %121  }
  0x99   :  { %118 = vst.msk [vmem:[#allocation0] sm:$0x1] %vm117_vm3, %v116_v50  }
  0x9a   :  { %124 = vst.msk [vmem:[#allocation0] sm:$0x1] %vm123_vm4, %v122_v51  }
  0x9c   :  { %v128_v52 = vpop.permute.xlu0 %127   ;;  %v134_v53 = vpop.permute.xlu1 %133  }
  0x9d   :  { %130 = vst.msk [vmem:[#allocation0] sm:$0x1] %vm129_vm5, %v128_v52  }
  0x9e   :  { %136 = vst.msk [vmem:[#allocation0] sm:$0x1] %vm135_vm6, %v134_v53  }
  0xa0   :  { %v140_v54 = vpop.permute.xlu0 %139   ;;  %v146_v55 = vpop.permute.xlu1 %145  }
  0xa1   :  { %142 = vst.msk [vmem:[#allocation0] sm:$0x1] %vm141_vm7, %v140_v54  }
  0xa2   :  { %148 = vst.msk [vmem:[#allocation0] sm:$0x1] %vm147_vm8, %v146_v55  }
  0xa4   :  { %v152_v56 = vpop.permute.xlu0 %151   ;;  %v158_v57 = vpop.permute.xlu1 %157  }
  0xa5   :  { %154 = vst.msk [vmem:[#allocation0] sm:$0x1] %vm153_vm9, %v152_v56  }
  0xa6   :  { %160 = vst.msk [vmem:[#allocation0] sm:$0x1] %vm159_vm10, %v158_v57  }
  0xa8   :  { %v164_v58 = vpop.permute.xlu0 %163   ;;  %v170_v59 = vpop.permute.xlu1 %169  }
  0xa9   :  { %166 = vst.msk [vmem:[#allocation0] sm:$0x1] %vm165_vm11, %v164_v58  }
  0xaa   :  { %172 = vst.msk [vmem:[#allocation0] sm:$0x1] %vm171_vm12, %v170_v59  }
  0xac   :  { %v176_v60 = vpop.permute.xlu0 %175   ;;  %v182_v61 = vpop.permute.xlu1 %181  }
  0xad   :  { %178 = vst.msk [vmem:[#allocation0] sm:$0x1] %vm177_vm13, %v176_v60  }
  0xae   :  { %184 = vst.msk [vmem:[#allocation0] sm:$0x1] %vm183_vm14, %v182_v61  }
  0xb0   :  { %v188_v62 = vpop.permute.xlu0 %187  }
  0xb1   :  { %190 = vst.msk [vmem:[#allocation0] sm:$0x1] %vm189_vm15, %v188_v62  }
  0xb8   :  { %v194_v63 = vld [vmem:[#allocation0] sm:$0x1] }
  0xb9   :  { %196 = vst [vmem:[%s400_s1] sm:$0x1] %v194_v63 }

// kernel: basic_block_forward.1
= control target key start
LH: loop header
LB: loop body
LE: loop exit
PB: predicated region body
PF: predicated region fallthrough
CT: control target
= control target key end

     0   :  { %v1081_v0 = vmov 0.0   ;;  %vm1082_vm0 = vmmov 0   ;;  %v23_v11 = vlaneseq  ;;  %vm1083_vm3 = vmmov 1   ;;  %s1388_s1 = inlined_call_operand.vmem [shape: bf16[3,128,128], index: 1, kind: input, shape index: {}]   ;;  %s1389_s0 = inlined_call_operand.vmem [shape: f32[16,128], index: 0, kind: input, shape index: {}]   ;;  %s1390_s2 = inlined_call_operand.vmem [shape: bf16[3,128,128], index: 2, kind: input, shape index: {}]   ;;  %s1391_s3 = inlined_call_operand.vmem [shape: f32[1,128], index: 3, kind: input, shape index: {}]   ;;  %s1392_s4 = inlined_call_operand.vmem [shape: f32[1,128], index: 4, kind: input, shape index: {}]   ;;  %s1393_s5 = inlined_call_operand.vmem [shape: f32[16,128], index: 5, kind: output, shape index: {}]  }
   0x1   :  { %910 = vmatprep.subr.bf16.mxu0 %v1081_v0  ;;  %930 = vmatprep.subr.bf16.mxu1 %v1081_v0  ;;  %v1033_v1 = vld [vmem:[%s1388_s1 + $0x40] sm:$0xff]   ;;  %v1035_v3 = vld [vmem:[%s1388_s1 + $0x48] sm:$0xff]   ;;  %v1037_v5 = vld [vmem:[%s1388_s1 + $0x50] sm:$0xff]  }
   0x2   :  { %v1034_v2 = vld [vmem:[%s1388_s1] sm:$0xff]   ;;  %926 = vmatprep.mubr.msk.bf16.mxu0 %vm1082_vm0, %v1081_v0  ;;  %946 = vmatprep.mubr.msk.bf16.mxu1 %vm1082_vm0, %v1081_v0  ;;  %v1036_v4 = vld [vmem:[%s1388_s1 + $0x8] sm:$0xff]   ;;  %v1038_v6 = vld [vmem:[%s1388_s1 + $0x10] sm:$0xff]   ;;  %v1176_v16 = vshrl.u32 %v23_v11, 7 }
   0x3   :  { %911 = vmatpush3.bf16.msra.mxu0 %v1033_v1  ;;  %931 = vmatpush3.bf16.msra.mxu1 %v1034_v2  ;;  %v1039_v7 = vld [vmem:[%s1388_s1 + $0x58] sm:$0xff]   ;;  %v1041_v9 = vld [vmem:[%s1388_s1 + $0x60] sm:$0xff]   ;;  %v1043_v12 = vld [vmem:[%s1388_s1 + $0x68] sm:$0xff]  }
   0x4   :  { %912 = vmatprep.subr.bf16.mxu0 %v1081_v0  ;;  %932 = vmatprep.subr.bf16.mxu1 %v1081_v0  ;;  %v1040_v8 = vld [vmem:[%s1388_s1 + $0x18] sm:$0xff]   ;;  %v1042_v10 = vld [vmem:[%s1388_s1 + $0x20] sm:$0xff]   ;;  %v1044_v13 = vld [vmem:[%s1388_s1 + $0x28] sm:$0xff]   ;;  %vm32_vm1 = vcmp.lt.s32.totalorder %v1176_v16, 1  ;;  %vm26_vm2 = vcmp.ge.s32.totalorder %v1176_v16, 1  ;;  %v25_v37 = vadd.s32 8, %v1176_v16 }
   0x5   :  { %v1168_v14 = vld [vmem:[%s1389_s0] sm:$0xff]  ;;  %v1174_v15 = vld [vmem:[%s1389_s0 + $0x8] sm:$0xff]  ;;  %v1045_v17 = vld [vmem:[%s1388_s1 + $0x70] sm:$0xff]   ;;  %vm39_vm5 = vcmp.lt.s32.totalorder %v1176_v16, 7 }
   0x6   :  { %v1046_v18 = vld [vmem:[%s1388_s1 + $0x30] sm:$0xff]   ;;  %v30_v19 = vrot.slane %v1168_v14, 7  ;;  %v31_v20 = vrot.slane %v1174_v15, 7  ;;  %v1047_v21 = vld [vmem:[%s1388_s1 + $0x78] sm:$0xff]   ;;  %v61_v25 = vpack.c.bf16 %v1174_v15, %v1168_v14  ;;  %v1049_v27 = vld [vmem:[%s1388_s1 + $0x80] sm:$0xff]   ;;  %v37_v34 = vrot.slane %v1168_v14, 1 }
   0x7   :  { %913 = vmatpush3.bf16.msra.mxu0 %v1035_v3  ;;  %933 = vmatpush3.bf16.msra.mxu1 %v1036_v4  ;;  %v1048_v22 = vld [vmem:[%s1388_s1 + $0x38] sm:$0xff]   ;;  %vm1208_vm4 = vmpackc.low %vm1083_vm3, %vm26_vm2  ;;  %v1050_v29 = vld [vmem:[%s1388_s1 + $0x88] sm:$0xff]   ;;  %v38_v35 = vrot.slane %v1174_v15, 1  ;;  %vm29_vm6 = vcmp.le.s32.totalorder %v25_v37, 14 }
   0x8   :  { %914 = vmatprep.subr.bf16.mxu0 %v1081_v0  ;;  %934 = vmatprep.subr.bf16.mxu1 %v1081_v0  ;;  %v33_v23 = vsel %vm32_vm1, %v30_v19, %v31_v20  ;;  %v34_v24 = vsel %vm32_vm1, %v31_v20, %v30_v19  ;;  %v1051_v30 = vld [vmem:[%s1388_s1 + $0x90] sm:$0xff]   ;;  %v1052_v31 = vld [vmem:[%s1388_s1 + $0x98] sm:$0xff]   ;;  %v1053_v32 = vld [vmem:[%s1388_s1 + $0xa0] sm:$0xff]  }
   0x9   :  { %v763_v26 = vpack.c.bf16 %v33_v23, %v34_v24  ;;  %v1054_v33 = vld [vmem:[%s1388_s1 + $0xa8] sm:$0xff]   ;;  %v1055_v36 = vld [vmem:[%s1388_s1 + $0xb0] sm:$0xff]   ;;  %v1056_v38 = vld [vmem:[%s1388_s1 + $0xb8] sm:$0xff]   ;;  %v40_v39 = vsel %vm39_vm5, %v37_v34, %v38_v35  ;;  %v41_v40 = vsel %vm39_vm5, %v38_v35, %v37_v34 }
   0xa   :  { %v790_v41 = vpack.c.bf16 %v41_v40, %v40_v39  ;;  %vm1257_vm7 = vmpackc.low %vm29_vm6, %vm1083_vm3  ;;  %v1057_v43 = vld [vmem:[%s1390_s2 + $0x40] sm:$0xff]   ;;  %v1058_v44 = vld [vmem:[%s1390_s2 + $0x48] sm:$0xff]  }
   0xb   :  { %915 = vmatpush3.bf16.msra.mxu0 %v1037_v5  ;;  %935 = vmatpush3.bf16.msra.mxu1 %v1038_v6  ;;  %v1059_v45 = vld [vmem:[%s1390_s2] sm:$0xff]   ;;  %v1061_v46 = vld [vmem:[%s1390_s2 + $0x8] sm:$0xff]   ;;  %v1060_v47 = vld [vmem:[%s1390_s2 + $0x50] sm:$0xff]  }
   0xc   :  { %916 = vmatprep.subr.bf16.mxu0 %v1081_v0  ;;  %936 = vmatprep.subr.bf16.mxu1 %v1081_v0  ;;  %v1063_v48 = vld [vmem:[%s1390_s2 + $0x10] sm:$0xff]   ;;  %v1062_v49 = vld [vmem:[%s1390_s2 + $0x58] sm:$0xff]   ;;  %v1064_v51 = vld [vmem:[%s1390_s2 + $0x60] sm:$0xff]  }
   0xd   :  { %v1065_v50 = vld [vmem:[%s1390_s2 + $0x18] sm:$0xff]   ;;  %v1067_v52 = vld [vmem:[%s1390_s2 + $0x20] sm:$0xff]   ;;  %v1066_v53 = vld [vmem:[%s1390_s2 + $0x68] sm:$0xff]  }
   0xe   :  { %v1068_v54 = vld [vmem:[%s1390_s2 + $0x70] sm:$0xff]   ;;  %v1069_v55 = vld [vmem:[%s1390_s2 + $0x28] sm:$0xff]   ;;  %v1070_v56 = vld [vmem:[%s1390_s2 + $0x78] sm:$0xff]  }
   0xf   :  { %917 = vmatpush3.bf16.msra.mxu0 %v1039_v7  ;;  %937 = vmatpush3.bf16.msra.mxu1 %v1040_v8  ;;  %v1071_v57 = vld [vmem:[%s1390_s2 + $0x30] sm:$0xff]   ;;  %v1072_v58 = vld [vmem:[%s1390_s2 + $0x38] sm:$0xff]   ;;  %v792_v7 = vld [vmem:[%s1391_s3] ss:$0 sm:$0xff] }
  0x10   :  { %918 = vmatprep.subr.bf16.mxu0 %v1081_v0  ;;  %938 = vmatprep.subr.bf16.mxu1 %v1081_v0  ;;  %v1075_v16 = vld [vmem:[%s1390_s2 + $0x90] sm:$0xff]   ;;  %v1076_v34 = vld [vmem:[%s1390_s2 + $0x98] sm:$0xff]   ;;  %v1077_v28 = vld [vmem:[%s1390_s2 + $0xa0] sm:$0xff]  }
  0x11   :  { %v1078_v35 = vld [vmem:[%s1390_s2 + $0xa8] sm:$0xff]   ;;  %v1080_v37 = vld [vmem:[%s1390_s2 + $0xb8] sm:$0xff]  }
  0x13   :  { %919 = vmatpush3.bf16.msra.mxu0 %v1041_v9  ;;  %939 = vmatpush3.bf16.msra.mxu1 %v1042_v10 }
  0x14   :  { %920 = vmatprep.subr.bf16.mxu0 %v1081_v0  ;;  %940 = vmatprep.subr.bf16.mxu1 %v1081_v0 }
  0x17   :  { %921 = vmatpush3.bf16.msra.mxu0 %v1043_v12  ;;  %941 = vmatpush3.bf16.msra.mxu1 %v1044_v13 }
  0x18   :  { %922 = vmatprep.subr.bf16.mxu0 %v1081_v0  ;;  %942 = vmatprep.subr.bf16.mxu1 %v1081_v0 }
  0x1b   :  { %923 = vmatpush3.bf16.msra.mxu0 %v1045_v17  ;;  %943 = vmatpush3.bf16.msra.mxu1 %v1046_v18 }
  0x1c   :  { %924 = vmatprep.subr.bf16.mxu0 %v1081_v0  ;;  %944 = vmatprep.subr.bf16.mxu1 %v1081_v0 }
  0x1f   :  { %925 = vmatpush3.bf16.msra.mxu0 %v1047_v21  ;;  %945 = vmatpush3.bf16.msra.mxu1 %v1048_v22  ;;  %v1073_v21 = vld [vmem:[%s1390_s2 + $0x80] sm:$0xff]  }
  0x20   :  { %950 = vmatprep.subr.bf16.mxu0 %v1081_v0  ;;  %970 = vmatprep.subr.bf16.mxu1 %v1081_v0 }
  0x22   :  { %927 = vmatmul.mubr.bf16.vlgmr.msra.gmra.mrb[0].mxu0 %v61_v25  ;;  %947 = vmatmul.mubr.msk.bf16.vlgmr.msra.gmra.mrb[0].mxu1 %vm1208_vm4, %v763_v26 }
  0x23   :  { %951 = vmatpush3.bf16.msra.mxu0 %v1049_v27  ;;  %966 = vmatprep.mubr.msk.bf16.mxu0 %vm1082_vm0, %v1081_v0 }
  0x24   :  { %952 = vmatprep.subr.bf16.mxu0 %v1081_v0  ;;  %986 = vmatprep.mubr.msk.bf16.mxu1 %vm1082_vm0, %v1081_v0 }
  0x25   :  { %971 = vmatpush3.bf16.msra.mxu1 %v1057_v43 }
  0x26   :  { %972 = vmatprep.subr.bf16.mxu1 %v1081_v0 }
  0x27   :  { %953 = vmatpush3.bf16.msra.mxu0 %v1050_v29 }
  0x28   :  { %954 = vmatprep.subr.bf16.mxu0 %v1081_v0 }
  0x29   :  { %973 = vmatpush3.bf16.msra.mxu1 %v1058_v44 }
  0x2a   :  { %974 = vmatprep.subr.bf16.mxu1 %v1081_v0 }
  0x2b   :  { %955 = vmatpush3.bf16.msra.mxu0 %v1051_v30 }
  0x2c   :  { %956 = vmatprep.subr.bf16.mxu0 %v1081_v0 }
  0x2d   :  { %975 = vmatpush3.bf16.msra.mxu1 %v1060_v47 }
  0x2e   :  { %976 = vmatprep.subr.bf16.mxu1 %v1081_v0 }
  0x2f   :  { %957 = vmatpush3.bf16.msra.mxu0 %v1052_v31 }
  0x30   :  { %958 = vmatprep.subr.bf16.mxu0 %v1081_v0 }
  0x31   :  { %977 = vmatpush3.bf16.msra.mxu1 %v1062_v49 }
  0x32   :  { %978 = vmatprep.subr.bf16.mxu1 %v1081_v0 }
  0x33   :  { %959 = vmatpush3.bf16.msra.mxu0 %v1053_v32  ;;  %v1074_v32 = vld [vmem:[%s1390_s2 + $0x88] sm:$0xff]  }
  0x34   :  { %960 = vmatprep.subr.bf16.mxu0 %v1081_v0 }
  0x35   :  { %979 = vmatpush3.bf16.msra.mxu1 %v1064_v51 }
  0x36   :  { %980 = vmatprep.subr.bf16.mxu1 %v1081_v0 }
  0x37   :  { %961 = vmatpush3.bf16.msra.mxu0 %v1054_v33 }
  0x38   :  { %962 = vmatprep.subr.bf16.mxu0 %v1081_v0 }
  0x39   :  { %981 = vmatpush3.bf16.msra.mxu1 %v1066_v53 }
  0x3a   :  { %982 = vmatprep.subr.bf16.mxu1 %v1081_v0 }
  0x3b   :  { %963 = vmatpush3.bf16.msra.mxu0 %v1055_v36  ;;  %v1079_v36 = vld [vmem:[%s1390_s2 + $0xb0] sm:$0xff]  }
  0x3c   :  { %964 = vmatprep.subr.bf16.mxu0 %v1081_v0 }
  0x3d   :  { %983 = vmatpush3.bf16.msra.mxu1 %v1068_v54 }
  0x3e   :  { %984 = vmatprep.subr.bf16.mxu1 %v1081_v0 }
  0x3f   :  { %965 = vmatpush3.bf16.msra.mxu0 %v1056_v38 }
  0x40   :  { %990 = vmatprep.subr.bf16.mxu0 %v1081_v0 }
  0x41   :  { %985 = vmatpush3.bf16.msra.mxu1 %v1070_v56 }
  0x42   :  { %967 = vmatmul.mubr.msk.bf16.vlgmr.msra.gmra.mrb[4].mxu0 %vm1257_vm7, %v790_v41  ;;  %1010 = vmatprep.subr.bf16.mxu1 %v1081_v0 }
  0x43   :  { %1006 = vmatprep.mubr.msk.bf16.mxu0 %vm1082_vm0, %v1081_v0  ;;  %991 = vmatpush3.bf16.msra.mxu0 %v1059_v45 }
  0x44   :  { %992 = vmatprep.subr.bf16.mxu0 %v1081_v0 }
  0x47   :  { %993 = vmatpush3.bf16.msra.mxu0 %v1061_v46 }
  0x48   :  { %994 = vmatprep.subr.bf16.mxu0 %v1081_v0 }
  0x4b   :  { %995 = vmatpush3.bf16.msra.mxu0 %v1063_v48 }
  0x4c   :  { %996 = vmatprep.subr.bf16.mxu0 %v1081_v0 }
  0x4f   :  { %997 = vmatpush3.bf16.msra.mxu0 %v1065_v50  ;;  %v855_v50 = vld [vmem:[%s1392_s4] ss:$0 sm:$0xff] }
  0x50   :  { %998 = vmatprep.subr.bf16.mxu0 %v1081_v0 }
  0x53   :  { %999 = vmatpush3.bf16.msra.mxu0 %v1067_v52 }
  0x54   :  { %1000 = vmatprep.subr.bf16.mxu0 %v1081_v0 }
  0x57   :  { %1001 = vmatpush3.bf16.msra.mxu0 %v1069_v55 }
  0x58   :  { %1002 = vmatprep.subr.bf16.mxu0 %v1081_v0 }
  0x5b   :  { %1003 = vmatpush3.bf16.msra.mxu0 %v1071_v57 }
  0x5c   :  { %1004 = vmatprep.subr.bf16.mxu0 %v1081_v0 }
  0x5f   :  { %1005 = vmatpush3.bf16.msra.mxu0 %v1072_v58 }
  0xf5   :  { %v161_v59 = vpop.f32.mrb[0].mxu0  ;;  %v250_v60 = vpop.f32.mrb[0].mxu1 }
  0xf6   :  { %v928_v61 = vpop.f32.mrb[1].mxu0  ;;  %v251_v62 = vadd.f32 %v250_v60, %v161_v59  ;;  %v948_v63 = vpop.f32.mrb[1].mxu1 }
  0xf7   :  { %v164_v1 = vpop.f32.mrb[2].mxu0  ;;  %v253_v2 = vpop.f32.mrb[2].mxu1 }
  0xf8   :  { %v929_v3 = vpop.f32.mrb[3].mxu0  ;;  %v254_v4 = vadd.f32 %v253_v2, %v164_v1  ;;  %v949_v5 = vpop.f32.mrb[3].mxu1 }
 0x115   :  { %v357_v6 = vpop.f32.mrb[4].mxu0 }
 0x116   :  { %v364_v8 = vadd.f32 %v357_v6, %v251_v62  ;;  %v968_v9 = vpop.f32.mrb[5].mxu0 }
 0x117   :  { %v360_v10 = vpop.f32.mrb[6].mxu0 }
 0x118   :  { %v373_v11 = vadd.f32 %v792_v7, %v364_v8  ;;  %v365_v12 = vadd.f32 %v360_v10, %v254_v4  ;;  %v969_v13 = vpop.f32.mrb[7].mxu0 }
 0x11a   :  { %v375_v17 = vmax.f32 %v373_v11, 0.0  ;;  %v374_v18 = vadd.f32 %v792_v7, %v365_v12 }
 0x11c   :  { %v376_v19 = vmax.f32 %v374_v18, 0.0  ;;  %v377_v20 = vrot.slane %v375_v17, 7  ;;  %v383_v22 = vrot.slane %v375_v17, 1 }
 0x11e   :  { %v378_v23 = vrot.slane %v376_v19, 7  ;;  %v384_v24 = vrot.slane %v376_v19, 1  ;;  %v406_v25 = vpack.c.bf16 %v376_v19, %v375_v17 }
 0x120   :  { %v379_v26 = vsel %vm32_vm1, %v377_v20, %v378_v23  ;;  %v380_v27 = vsel %vm32_vm1, %v378_v23, %v377_v20  ;;  %v385_v29 = vsel %vm39_vm5, %v383_v22, %v384_v24  ;;  %v386_v30 = vsel %vm39_vm5, %v384_v24, %v383_v22  ;;  %987 = vmatmul.mubr.bf16.vlgmr.msra.gmra.mrb[4].mxu1 %v406_v25 }
 0x121   :  { %1011 = vmatpush3.bf16.msra.mxu1 %v1073_v21  ;;  %v826_v31 = vpack.c.bf16 %v379_v26, %v380_v27  ;;  %1026 = vmatprep.mubr.msk.bf16.mxu1 %vm1082_vm0, %v1081_v0  ;;  %v853_v33 = vpack.c.bf16 %v386_v30, %v385_v29 }
 0x122   :  { %1012 = vmatprep.subr.bf16.mxu1 %v1081_v0 }
 0x123   :  { %1007 = vmatmul.mubr.msk.bf16.vlgmr.msra.gmra.mrb[8].mxu0 %vm1208_vm4, %v826_v31 }
 0x125   :  { %1013 = vmatpush3.bf16.msra.mxu1 %v1074_v32 }
 0x126   :  { %1014 = vmatprep.subr.bf16.mxu1 %v1081_v0 }
 0x129   :  { %1015 = vmatpush3.bf16.msra.mxu1 %v1075_v16 }
 0x12a   :  { %1016 = vmatprep.subr.bf16.mxu1 %v1081_v0 }
 0x12d   :  { %1017 = vmatpush3.bf16.msra.mxu1 %v1076_v34 }
 0x12e   :  { %1018 = vmatprep.subr.bf16.mxu1 %v1081_v0 }
 0x131   :  { %1019 = vmatpush3.bf16.msra.mxu1 %v1077_v28 }
 0x132   :  { %1020 = vmatprep.subr.bf16.mxu1 %v1081_v0 }
 0x135   :  { %1021 = vmatpush3.bf16.msra.mxu1 %v1078_v35 }
 0x136   :  { %1022 = vmatprep.subr.bf16.mxu1 %v1081_v0 }
 0x139   :  { %1023 = vmatpush3.bf16.msra.mxu1 %v1079_v36 }
 0x13a   :  { %1024 = vmatprep.subr.bf16.mxu1 %v1081_v0 }
 0x13d   :  { %1025 = vmatpush3.bf16.msra.mxu1 %v1080_v37 }
 0x140   :  { %1027 = vmatmul.mubr.msk.bf16.vlgmr.msra.gmra.mrb[8].mxu1 %vm1257_vm7, %v853_v33 }
 0x1f3   :  { %v506_v38 = vpop.f32.mrb[4].mxu1 }
 0x1f4   :  { %v988_v39 = vpop.f32.mrb[5].mxu1 }
 0x1f5   :  { %v509_v40 = vpop.f32.mrb[6].mxu1 }
 0x1f6   :  { %v989_v41 = vpop.f32.mrb[7].mxu1  ;;  %v595_v43 = vpop.f32.mrb[8].mxu0 }
 0x1f7   :  { %v596_v44 = vadd.f32 %v595_v43, %v506_v38  ;;  %v1008_v45 = vpop.f32.mrb[9].mxu0 }
 0x1f8   :  { %v598_v46 = vpop.f32.mrb[10].mxu0 }
 0x1f9   :  { %v599_v47 = vadd.f32 %v598_v46, %v509_v40  ;;  %v1009_v48 = vpop.f32.mrb[11].mxu0 }
 0x213   :  { %v702_v49 = vpop.f32.mrb[8].mxu1 }
 0x214   :  { %v709_v0 = vadd.f32 %v702_v49, %v596_v44  ;;  %v1028_v51 = vpop.f32.mrb[9].mxu1 }
 0x215   :  { %v705_v52 = vpop.f32.mrb[10].mxu1 }
 0x216   :  { %v718_v42 = vadd.f32 %v855_v50, %v709_v0  ;;  %v710_v53 = vadd.f32 %v705_v52, %v599_v47  ;;  %v1029_v54 = vpop.f32.mrb[11].mxu1 }
 0x218   :  { %v720_v55 = vadd.f32 %v718_v42, %v1168_v14  ;;  %v719_v56 = vadd.f32 %v855_v50, %v710_v53 }
 0x21a   :  { %v722_v57 = vmax.f32 %v720_v55, 0.0  ;;  %v721_v58 = vadd.f32 %v719_v56, %v1174_v15 }
 0x21c   :  { %724 = vst [vmem:[%s1393_s5] sm:$0xff] %v722_v57  ;;  %v723_v59 = vmax.f32 %v721_v58, 0.0 }
 0x21e   :  { %725 = vst [vmem:[%s1393_s5 + $0x8] sm:$0xff] %v723_v59 }

</bundles_post_ra>
